<compile_context>
chip_gen: v5e
topology: v5e:2x2
jax: 0.10.0
libtpu: 0.0.40
codegen_flags: <defaults>
</compile_context>

<pallas_src>
import functools

import jax
import jax.numpy as jnp
from jax.experimental import pallas as pl
from jax.experimental.pallas import tpu as pltpu

EPS = 1e-8
SMOOTH = 0.01

_LANE = 128
# Hard cap on the per-step logit block (f32-equivalent bytes); ~6-8 MiB is enough to
# amortize the per-step overhead on all generations.
_BLOCK_BYTES_CAP = 8 * 1024 * 1024


def _round_up(x, m):
    return (x + m - 1) // m * m


def _vmem_limit_bytes():
    """Generation-aware scoped-VMEM limit (v7x has only 64 MiB physical per core)."""
    phys = None
    try:
        info = pltpu.get_tpu_info()
        for name in ("vmem_capacity_bytes", "vmem_bytes", "vmem_size_bytes"):
            v = getattr(info, name, None)
            if v:
                phys = int(v)
                break
    except Exception:
        phys = None
    if not phys:
        phys = 64 * 1024 * 1024  # assume the smallest (v7x) if the query fails
    # Leave headroom for Mosaic internal scratch; never ask for more than ~100 MiB.
    return int(max(32 * 1024 * 1024, min(phys - 16 * 1024 * 1024, 100 * 1024 * 1024)))


def _plan_tiling(B, C, S, block_budget_bytes):
    """Pick (BT, TS, n_spatial_steps, S_padded)."""
    s_pad = _round_up(S, _LANE)
    # Max lanes per step for BT=1 given the f32-equivalent block budget.
    ts_max = max(_LANE, (block_budget_bytes // (C * 4)) // _LANE * _LANE)
    if s_pad <= ts_max:
        # Whole (padded) spatial extent fits in one step; block several batch elements
        # to amortize per-step overhead, but keep grid[0] >= 2 for v7x megacore.
        ts = s_pad
        n_s = 1
        bt_cap = max(1, block_budget_bytes // (C * 4 * ts))
        bt_cap = min(bt_cap, 8)
        if B >= 2:
            bt_cap = min(bt_cap, max(1, B // 2))
        bt = 1
        for d in range(min(bt_cap, B), 0, -1):
            if B % d == 0:
                bt = d
                break
    else:
        # Spatial tiling with a masked remainder: choose the step count first so the
        # padding waste is at most n_s * 127 pixels.
        n_s = -(-s_pad // ts_max)                       # cdiv
        ts = _round_up(-(-s_pad // n_s), _LANE)
        bt = 1
        # TODO(synk): if B == 1 on v7x, a 'parallel' spatial split with partial outputs
        #             summed in the wrapper would feed the second core.
    return bt, ts, n_s, ts * n_s


def _gdice_ce_kernel(logit_ref, gt_ref, out_ref, inter_ref, nll_ref, *,
                     s_valid, ts, masked, dice_weight, ce_weight):
    s = pl.program_id(1)
    ns = pl.num_programs(1)

    @pl.when(s == 0)
    def _init():
        inter_ref[...] = jnp.zeros_like(inter_ref)
        nll_ref[...] = jnp.zeros_like(nll_ref)

    # Inputs arrive in their native (narrow) dtypes; cast in VMEM after the DMA.
    logit = logit_ref[...].astype(jnp.float32)       # (BT, C, TS)
    gt = gt_ref[...].astype(jnp.int32)               # (BT, 1, TS)
    c = logit.shape[1]

    # Numerically stable softmax pieces; exp is computed exactly once and reused.
    m = jnp.max(logit, axis=1, keepdims=True)        # (BT, 1, TS)
    e = jnp.exp(logit - m)                           # (BT, C, TS)
    z = jnp.sum(e, axis=1, keepdims=True)            # (BT, 1, TS)

    # Tiny (1, C, 1) class-index constant; the broadcast happens inside the compare,
    # so no (C, TS) iota is regenerated each step and no f32 onehot is materialized.
    cls = jax.lax.broadcasted_iota(jnp.int32, (1, c, 1), 1)
    picked_e = jnp.sum(jnp.where(cls == gt, e, 0.0), axis=1, keepdims=True)  # (BT,1,TS)

    p_gt = picked_e / z                              # softmax prob of the gt class
    nll = -jnp.log(p_gt)                             # == logsumexp - picked_logit

    if masked:
        # Positional mask for the padded spatial remainder.
        pos = s * ts + jax.lax.broadcasted_iota(jnp.int32, (1, 1, ts), 2)
        valid = pos < s_valid
        p_gt = jnp.where(valid, p_gt, 0.0)
        nll = jnp.where(valid, nll, 0.0)

    # Lane-wide accumulators: pure VPU adds per step; cross-lane reduce deferred.
    inter_ref[...] += p_gt
    nll_ref[...] += nll

    @pl.when(s == ns - 1)
    def _finalize():
        intersect = jnp.sum(inter_ref[...], axis=2, keepdims=True)   # (BT, 1, 1)
        nll_sum = jnp.sum(nll_ref[...], axis=2, keepdims=True)       # (BT, 1, 1)
        # For valid labels pred.sum() == gt.sum() == S, so the GDice denominator is
        # 2*S analytically (with_weight=False).
        denom = 2.0 * s_valid + EPS + SMOOTH
        dice = 1.0 - (intersect + SMOOTH) / denom
        ce = nll_sum * (1.0 / s_valid)
        out_ref[...] = (dice_weight * dice + ce_weight * ce).astype(out_ref.dtype)


def gdice_ce_loss(logit, gt, *, dice_weight=1.0, ce_weight=1.0, max_block_bytes=None):
    """logit: (B, C, H, W) float (any dtype), gt: (B, H, W) int labels. Returns scalar."""
    B, C, H, W = logit.shape
    S = H * W

    # Keep logits in their native dtype in HBM (cast happens in-kernel); narrow the
    # label stream to 1 byte/pixel when the class count allows it.
    logit3 = logit.reshape(B, C, S)
    gt_dtype = jnp.int8 if C <= 127 else jnp.int32
    gt3 = gt.reshape(B, 1, S).astype(gt_dtype)

    vmem_limit = _vmem_limit_bytes()
    if max_block_bytes is None:
        # ~1/8 of the scoped limit per logit block leaves room for 2x double-buffered
        # inputs + f32 intermediates + accumulators on every generation.
        max_block_bytes = min(_BLOCK_BYTES_CAP, vmem_limit // 8)
    bt, ts, n_s, s_padded = _plan_tiling(B, C, S, int(max_block_bytes))

    masked = s_padded != S
    if masked:
        pad = s_padded - S
        logit3 = jnp.pad(logit3, ((0, 0), (0, 0), (0, pad)))
        gt3 = jnp.pad(gt3, ((0, 0), (0, 0), (0, pad)))

    kernel = functools.partial(
        _gdice_ce_kernel,
        s_valid=int(S),
        ts=int(ts),
        masked=bool(masked),
        dice_weight=float(dice_weight),
        ce_weight=float(ce_weight),
    )

    loss_b = pl.pallas_call(
        kernel,
        out_shape=jax.ShapeDtypeStruct((B, 1, 1), jnp.float32),
        grid_spec=pltpu.PrefetchScalarGridSpec(
            num_scalar_prefetch=0,
            grid=(B // bt, n_s),
            in_specs=[
                pl.BlockSpec((bt, C, ts), lambda b, s: (b, 0, s)),
                pl.BlockSpec((bt, 1, ts), lambda b, s: (b, 0, s)),
            ],
            out_specs=pl.BlockSpec((bt, 1, 1), lambda b, s: (b, 0, 0)),
            scratch_shapes=[
                pltpu.VMEM((bt, 1, ts), jnp.float32),   # intersect lane-wide accumulator
                pltpu.VMEM((bt, 1, ts), jnp.float32),   # nll lane-wide accumulator
            ],
        ),
        compiler_params=pltpu.CompilerParams(
            dimension_semantics=("parallel", "arbitrary"),
            vmem_limit_bytes=int(vmem_limit),
        ),
    )(logit3, gt3)

    # reduction='mean': dice mean over batch + CE mean over all pixels. Every batch
    # element has the same pixel count, so the mean of per-batch fused losses equals
    # dice_weight*mean(dice) + ce_weight*mean(per_pixel_ce).
    return jnp.mean(loss_b)


def _reference(logit, gt, dice_weight=1.0, ce_weight=1.0):
    B, C, H, W = logit.shape
    p = jax.nn.softmax(logit, axis=1).reshape(B, C, -1)
    oh = jax.nn.one_hot(gt.reshape(B, -1), C, axis=1, dtype=jnp.float32)  # (B, C, S)
    intersect = jnp.sum(p * oh, axis=(1, 2))
    denom = jnp.sum(p, axis=(1, 2)) + jnp.sum(oh, axis=(1, 2))
    dice = 1.0 - (intersect + SMOOTH) / (denom + EPS + SMOOTH)
    logp = jax.nn.log_softmax(logit, axis=1)
    nll = -jnp.take_along_axis(logp, gt[:, None, :, :].astype(jnp.int32), axis=1)[:, 0]
    return dice_weight * dice.mean() + ce_weight * nll.mean()


if __name__ == "__main__":
    key = jax.random.PRNGKey(0)

    def run_case(B, C, H, W, **kw):
        k1, k2 = jax.random.split(jax.random.fold_in(key, B * 100000 + C * 1000 + H))
        logit = jax.random.normal(k1, (B, C, H, W), dtype=jnp.float32)
        gt = jax.random.randint(k2, (B, H, W), 0, C, dtype=jnp.int32)
        out = jax.block_until_ready(gdice_ce_loss(logit, gt, **kw))
        ref = jax.block_until_ready(_reference(logit, gt))
        assert jnp.allclose(out, ref, rtol=1e-5, atol=1e-5), (out, ref)

    # Main small config (single spatial step).
    run_case(2, 4, 16, 16)
    # Masked remainder path (S = 81 is not a multiple of 128).
    run_case(2, 4, 9, 9)
    # Multi-step spatial accumulation path (tiny block budget to force tiling).
    run_case(2, 4, 32, 32, max_block_bytes=4096)

    print("KERNEL_OK")
</pallas_src>

<mosaic_0001>
module attributes {stable_mosaic.version = 11 : i64} {
  func.func @_gdice_ce_kernel(%arg0: i32, %arg1: i32, %arg2: memref<1x4x256xf32, #tpu.memory_space<vmem>>, %arg3: memref<1x1x256xi8, #tpu.memory_space<vmem>>, %arg4: memref<1x1x1xf32, #tpu.memory_space<vmem>>, %arg5: memref<1x1x256xf32, #tpu.memory_space<vmem>>, %arg6: memref<1x1x256xf32, #tpu.memory_space<vmem>>) attributes {dimension_semantics = [#tpu.dimension_semantics<parallel>, #tpu.dimension_semantics<arbitrary>], iteration_bounds = array<i64: 2, 1>, scalar_prefetch = 0 : i64, scratch_operands = 2 : i64, tpu.core_type = #tpu.core_type<tc>, window_params = [{transform_indices = @transform_0, window_bounds = array<i64: 1, 4, 256>}, {transform_indices = @transform_1, window_bounds = array<i64: 1, 1, 256>}, {transform_indices = @transform_2, window_bounds = array<i64: 1, 1, 1>}]} {
    %c0_i32 = arith.constant 0 : i32
    %0 = arith.cmpi eq, %arg1, %c0_i32 : i32
    %1 = arith.extui %0 : i1 to i32
    %c0_i32_0 = arith.constant 0 : i32
    %2 = arith.cmpi ne, %1, %c0_i32_0 : i32
    scf.if %2 {
      %cst_24 = arith.constant 0.000000e+00 : f32
      %34 = vector.broadcast %cst_24 : f32 to vector<1x1x256xf32>
      %c0_25 = arith.constant 0 : index
      %c0_26 = arith.constant 0 : index
      %c0_27 = arith.constant 0 : index
      %35 = vector.load %arg5[%c0_25, %c0_26, %c0_27] : memref<1x1x256xf32, #tpu.memory_space<vmem>>, vector<1x1x256xf32>
      tpu.vector_store %arg5[%c0_25, %c0_26, %c0_27], %34 {strides = array<i32>} : memref<1x1x256xf32, #tpu.memory_space<vmem>>, vector<1x1x256xf32>,
      %cst_28 = arith.constant 0.000000e+00 : f32
      %36 = vector.broadcast %cst_28 : f32 to vector<1x1x256xf32>
      %c0_29 = arith.constant 0 : index
      %c0_30 = arith.constant 0 : index
      %c0_31 = arith.constant 0 : index
      %37 = vector.load %arg6[%c0_29, %c0_30, %c0_31] : memref<1x1x256xf32, #tpu.memory_space<vmem>>, vector<1x1x256xf32>
      tpu.vector_store %arg6[%c0_29, %c0_30, %c0_31], %36 {strides = array<i32>} : memref<1x1x256xf32, #tpu.memory_space<vmem>>, vector<1x1x256xf32>,
    } else {
    }
    %c0 = arith.constant 0 : index
    %c0_1 = arith.constant 0 : index
    %c0_2 = arith.constant 0 : index
    %3 = vector.load %arg2[%c0, %c0_1, %c0_2] : memref<1x4x256xf32, #tpu.memory_space<vmem>>, vector<1x4x256xf32>
    %c0_3 = arith.constant 0 : index
    %c0_4 = arith.constant 0 : index
    %c0_5 = arith.constant 0 : index
    %4 = vector.load %arg3[%c0_3, %c0_4, %c0_5] : memref<1x1x256xi8, #tpu.memory_space<vmem>>, vector<1x1x256xi8>
    %5 = arith.extsi %4 : vector<1x1x256xi8> to vector<1x1x256xi32>
    %cst = arith.constant dense<0xFF800000> : vector<1x256xf32>
    %6 = vector.multi_reduction <maximumf>, %3, %cst [1] : vector<1x4x256xf32> to vector<1x256xf32>
    %7 = vector.shape_cast %6 : vector<1x256xf32> to vector<1x1x256xf32>
    %8 = vector.broadcast %7 : vector<1x1x256xf32> to vector<1x4x256xf32>
    %9 = arith.subf %3, %8 : vector<1x4x256xf32>
    %10 = math.exp %9 : vector<1x4x256xf32>
    %cst_6 = arith.constant dense<0.000000e+00> : vector<1x256xf32>
    %11 = vector.multi_reduction <add>, %10, %cst_6 [1] : vector<1x4x256xf32> to vector<1x256xf32>
    %12 = vector.shape_cast %11 : vector<1x256xf32> to vector<1x1x256xf32>
    %13 = tpu.iota {dimensions = array<i32: 1>} : vector<1x4x1xi32>
    %14 = vector.broadcast %13 : vector<1x4x1xi32> to vector<1x4x256xi32>
    %15 = vector.broadcast %5 : vector<1x1x256xi32> to vector<1x4x256xi32>
    %16 = arith.cmpi eq, %14, %15 : vector<1x4x256xi32>
    %cst_7 = arith.constant 0.000000e+00 : f32
    %17 = vector.broadcast %cst_7 : f32 to vector<1x4x256xf32>
    %18 = arith.select %16, %10, %17 : vector<1x4x256xi1>, vector<1x4x256xf32>
    %cst_8 = arith.constant dense<0.000000e+00> : vector<1x256xf32>
    %19 = vector.multi_reduction <add>, %18, %cst_8 [1] : vector<1x4x256xf32> to vector<1x256xf32>
    %20 = vector.shape_cast %19 : vector<1x256xf32> to vector<1x1x256xf32>
    %21 = arith.divf %20, %12 : vector<1x1x256xf32>
    %22 = math.log %21 : vector<1x1x256xf32>
    %cst_9 = arith.constant 0.000000e+00 : f32
    %23 = vector.broadcast %cst_9 : f32 to vector<1x1x256xf32>
    %24 = arith.subf %23, %22 : vector<1x1x256xf32>
    %c0_10 = arith.constant 0 : index
    %c0_11 = arith.constant 0 : index
    %c0_12 = arith.constant 0 : index
    %25 = vector.load %arg5[%c0_10, %c0_11, %c0_12] : memref<1x1x256xf32, #tpu.memory_space<vmem>>, vector<1x1x256xf32>
    %26 = arith.addf %25, %21 : vector<1x1x256xf32>
    %c0_13 = arith.constant 0 : index
    %c0_14 = arith.constant 0 : index
    %c0_15 = arith.constant 0 : index
    %27 = vector.load %arg5[%c0_13, %c0_14, %c0_15] : memref<1x1x256xf32, #tpu.memory_space<vmem>>, vector<1x1x256xf32>
    tpu.vector_store %arg5[%c0_13, %c0_14, %c0_15], %26 {strides = array<i32>} : memref<1x1x256xf32, #tpu.memory_space<vmem>>, vector<1x1x256xf32>,
    %c0_16 = arith.constant 0 : index
    %c0_17 = arith.constant 0 : index
    %c0_18 = arith.constant 0 : index
    %28 = vector.load %arg6[%c0_16, %c0_17, %c0_18] : memref<1x1x256xf32, #tpu.memory_space<vmem>>, vector<1x1x256xf32>
    %29 = arith.addf %28, %24 : vector<1x1x256xf32>
    %c0_19 = arith.constant 0 : index
    %c0_20 = arith.constant 0 : index
    %c0_21 = arith.constant 0 : index
    %30 = vector.load %arg6[%c0_19, %c0_20, %c0_21] : memref<1x1x256xf32, #tpu.memory_space<vmem>>, vector<1x1x256xf32>
    tpu.vector_store %arg6[%c0_19, %c0_20, %c0_21], %29 {strides = array<i32>} : memref<1x1x256xf32, #tpu.memory_space<vmem>>, vector<1x1x256xf32>,
    %c0_i32_22 = arith.constant 0 : i32
    %31 = arith.cmpi eq, %arg1, %c0_i32_22 : i32
    %32 = arith.extui %31 : i1 to i32
    %c0_i32_23 = arith.constant 0 : i32
    %33 = arith.cmpi ne, %32, %c0_i32_23 : i32
    scf.if %33 {
      %c0_24 = arith.constant 0 : index
      %c0_25 = arith.constant 0 : index
      %c0_26 = arith.constant 0 : index
      %34 = vector.load %arg5[%c0_24, %c0_25, %c0_26] : memref<1x1x256xf32, #tpu.memory_space<vmem>>, vector<1x1x256xf32>
      %cst_27 = arith.constant dense<0.000000e+00> : vector<1x1xf32>
      %35 = vector.multi_reduction <add>, %34, %cst_27 [2] : vector<1x1x256xf32> to vector<1x1xf32>
      %36 = vector.shape_cast %35 : vector<1x1xf32> to vector<1x1x1xf32>
      %c0_28 = arith.constant 0 : index
      %c0_29 = arith.constant 0 : index
      %c0_30 = arith.constant 0 : index
      %37 = vector.load %arg6[%c0_28, %c0_29, %c0_30] : memref<1x1x256xf32, #tpu.memory_space<vmem>>, vector<1x1x256xf32>
      %cst_31 = arith.constant dense<0.000000e+00> : vector<1x1xf32>
      %38 = vector.multi_reduction <add>, %37, %cst_31 [2] : vector<1x1x256xf32> to vector<1x1xf32>
      %39 = vector.shape_cast %38 : vector<1x1xf32> to vector<1x1x1xf32>
      %cst_32 = arith.constant 0.00999999977 : f32
      %40 = vector.broadcast %cst_32 : f32 to vector<1x1x1xf32>
      %41 = arith.addf %36, %40 : vector<1x1x1xf32>
      %cst_33 = arith.constant 5.120100e+02 : f32
      %42 = vector.broadcast %cst_33 : f32 to vector<1x1x1xf32>
      %43 = arith.divf %41, %42 : vector<1x1x1xf32>
      %cst_34 = arith.constant 1.000000e+00 : f32
      %44 = vector.broadcast %cst_34 : f32 to vector<1x1x1xf32>
      %45 = arith.subf %44, %43 : vector<1x1x1xf32>
      %cst_35 = arith.constant 3.906250e-03 : f32
      %46 = vector.broadcast %cst_35 : f32 to vector<1x1x1xf32>
      %47 = arith.mulf %39, %46 : vector<1x1x1xf32>
      %cst_36 = arith.constant 1.000000e+00 : f32
      %48 = vector.broadcast %cst_36 : f32 to vector<1x1x1xf32>
      %49 = arith.mulf %48, %45 : vector<1x1x1xf32>
      %cst_37 = arith.constant 1.000000e+00 : f32
      %50 = vector.broadcast %cst_37 : f32 to vector<1x1x1xf32>
      %51 = arith.mulf %50, %47 : vector<1x1x1xf32>
      %52 = arith.addf %49, %51 : vector<1x1x1xf32>
      %c0_38 = arith.constant 0 : index
      %c0_39 = arith.constant 0 : index
      %c0_40 = arith.constant 0 : index
      %53 = vector.load %arg4[%c0_38, %c0_39, %c0_40] : memref<1x1x1xf32, #tpu.memory_space<vmem>>, vector<1x1x1xf32>
      tpu.vector_store %arg4[%c0_38, %c0_39, %c0_40], %52 {strides = array<i32>} : memref<1x1x1xf32, #tpu.memory_space<vmem>>, vector<1x1x1xf32>,
    } else {
    }
    return
  }
  func.func @transform_0(%arg0: i32, %arg1: i32) -> (i32, i32, i32) {
    %c0_i32 = arith.constant 0 : i32
    %c0_i32_0 = arith.constant 0 : i32
    return %arg0, %c0_i32, %arg1 : i32, i32, i32
  }
  func.func @transform_1(%arg0: i32, %arg1: i32) -> (i32, i32, i32) {
    %c0_i32 = arith.constant 0 : i32
    %c0_i32_0 = arith.constant 0 : i32
    return %arg0, %c0_i32, %arg1 : i32, i32, i32
  }
  func.func @transform_2(%arg0: i32, %arg1: i32) -> (i32, i32, i32) {
    %c0_i32 = arith.constant 0 : i32
    %c0_i32_0 = arith.constant 0 : i32
    %c0_i32_1 = arith.constant 0 : i32
    return %arg0, %c0_i32, %c0_i32_0 : i32, i32, i32
  }
}

</mosaic_0001>

<bundles_post_ra>
// kernel: tpu_custom_call.1
= control target key start
LH: loop header
LB: loop body
LE: loop exit
PB: predicated region body
PF: predicated region fallthrough
CT: control target
= control target key end

     0   :  { %7 = vsyncpa [#allocation5], 0  ;;  %s784_s0 = inlined_call_operand.hbm [shape: f32[2,4,256], index: 0, kind: input, shape index: {}]   ;;  %s785_s1 = inlined_call_operand.vmem [shape: s8[2,1,256], index: 1, kind: input, shape index: {}]   ;;  %s786_s2 = inlined_call_operand.vmem [shape: f32[2,1,1], index: 2, kind: output, shape index: {}]  }
   0x1   :  { %9 = vsyncpa [#allocation5 + $0x1], 0  ;;  %s663_s9 = smov 0   ;;  %s665_s10 = smov 0  }
   0x2   :  { %s667_s11 = smov 0   ;;  %s669_s12 = smov 0  }
   0x3   :  { %s671_s13 = smov 0   ;;  %s673_s14 = smov 0  }
   0x4 LB: > { %s482_s15 = sadd.s32 4294967295, %s644_s14   ;;  %s27_s16 = sadd.s32 1, %s640_s13  ;;  %s644_s14 = sphi %s673_s14, %s15_s14   ;;  %s640_s13 = sphi %s671_s13, %s795_s13   ;;  %s636_s12 = sphi %s669_s12, %s794_s12   ;;  %s632_s11 = sphi %s667_s11, %s793_s11   ;;  %s628_s10 = sphi %s665_s10, %s792_s10   ;;  %s624_s9 = sphi %s663_s9, %s791_s9  }
   0x5   : > { %p29_p0 = scmp.ge.s32.totalorder %s27_s16, 2  ;;  %s36_s17 = sadd.s32 1, %s632_s11 }
   0x6   : > { %p43_p1 = scmp.ne.s32.totalorder %s632_s11, %s628_s10  ;;  %p44_p2 = scmp.eq.s32.totalorder %s644_s14, 0 }
   0x7   : > { %s797_s16 = smov (%p29_p0, %s27_s16), 0  ;;  %p49_p4 = scmp.ne.s32.totalorder %s628_s10, %s624_s9 }
   0x8   : > { %p699_p3 = por %p44_p2, %p43_p1  ;;  %s31_s19 = ssub.s32 %s640_s13, %s797_s16 }
   0x9   : > { %p50_p5 = scmp.eq.s32.totalorder %s482_s15, 0  ;;  %p34_p6 = scmp.eq.s32.totalorder %s31_s19, 0 }
   0xa   : > { %p501_p8 = scmp.lt.s32.totalorder %s644_s14, 2  ;;  %s127_s22 = sand.u32 1, %s632_s11  }
   0xb   : > { %p706_p7 = por %p50_p5, %p49_p4  ;;  %s494_s23 = sshll.u32 %s640_s13, 3 }
   0xc   : > { %s712_s21 = scalar_select %p34_p6, %s632_s11, %s36_s17  }
   0xd   : > { %s486_s24 = sshll.u32 %s127_s22, 3  ;;  %s138_s27 = scalar_lea.hbm %s784_s0, %s494_s23 }
   0xe   : > { %s140_s28 = sshll.u32 %s138_s27, 4  ;;  %s131_s29 = scalar_lea.vmem [#allocation4], %s486_s24  ;;  %s141_s28 = int_to_ptr.hbm [resolvable:$true] %s140_s28 }
   0xf   : > { %s142_s30 = sshll.u32 %s131_s29, 4  ;;  %p498_p9 = pnand %p501_p8, %p699_p3  ;;  %s143_s30 = int_to_ptr.vmem [resolvable:$true] %s142_s30 }
  0x10   : > { %p489_p10 = scmp.ge.s32.totalorder %s644_s14, 1  ;;  %p159_p11 = scmp.lt.s32.totalorder %s644_s14, 3 }
  0x11   : > { %s128_s3 = scalar_lea.sflag [#allocation5], %s127_s22 }
  0x12   : > { %500 = dma.hbm_to_vmem [thread:$0]  (!%p498_p9), %s141_s28, 128, %s143_s30, %s128_s3  }
  0x13   : > { %p160_p12 = pnand %p489_p10, %p159_p11 }
  0x14   : > { %s165_s4 = sand.u32 (!%p160_p12), 1, %s628_s10  }
  0x15   : > { %163 = sbr.rel (%p160_p12) target bundleno = 254 (0xfe), region = 28  ;;  %s490_s5 = sshll.u32 (!%p160_p12), %s165_s4, 3 }
  0x16   : > { %s166_s6 = scalar_lea.sflag (!%p160_p12), [#allocation5], %s165_s4  ;;  %s169_s7 = scalar_lea.vmem (!%p160_p12), [#allocation4], %s490_s5 }
  0x1a   : > { %619 = dma.done.wait (%p706_p7), %s166_s6, 128  }
  0x1b   : > { %621 = vsyncadd (%p706_p7), %s166_s6, 4294967168  ;;  %v214_v0 = vlaneseq  ;;  %v646_v2 = vmov 0.0   ;;  %v220_v3 = vld [vmem:[%s169_s7] sm:$0xff]  ;;  %vm229_vm1 = vcmask 1043456   ;;  %p199_p13 = scmp.lt.s32.totalorder %s636_s12, 1  ;;  %vm341_vm12 = vcmask 1040384  }
  0x1c   : > { %224 = vst [vmem:[#allocation1] ss:$2 sm:$0xff] %v220_v3  ;;  %vm395_vm14 = vcmask 0  }
  0x1d   : > { %vm728_vm0 = vcmp.lt.s32.totalorder %v214_v0, 256  ;;  %s799_s12 = smov (!%p199_p13, %s636_s12), 1  ;;  %v273_v33 = vshrl.u32 %v214_v0, 7 }
  0x1e   : > { %218 = vst.msk [vmem:[#allocation2] sm:$0x3] %vm728_vm0, %v646_v2  ;;  %s491_s8 = sshll.u32 %s799_s12, 1  ;;  %s209_s20 = scalar_lea.vmem %s786_s2, %s799_s12 }
  0x1f   : > { %219 = vst.msk [vmem:[#allocation3] sm:$0x3] %vm728_vm0, %v646_v2  ;;  %s205_s17 = scalar_lea.vmem %s785_s1, %s491_s8 }
  0x20   : > { %v221_v24 = vld [vmem:[%s205_s17] sm:$0x3] }
  0x21   : > { %v222_v26 = vunpack.c.0.s8 %v221_v24 }
  0x23   : > { %v225_v4 = vld.sshfl [vmem:[#allocation1] sm:$0xff pattern:$0x75316420]  ;;  %v226_v5 = vld.sshfl [vmem:[#allocation1 + $0x8] sm:$0xff pattern:$0x75316420] }
  0x24   : > { %v230_v6 = vsel %vm229_vm1, %v225_v4, -inf  ;;  %v237_v7 = vsel %vm229_vm1, %v226_v5, -inf  ;;  %v274_v27 = vperm.slane %v222_v26, 0  ;;  %v275_v28 = vperm.slane %v222_v26, 4 }
  0x25   : > { %v231_v8 = vrot.slane %v230_v6, 4  ;;  %v238_v9 = vrot.slane %v237_v7, 4 }
  0x26   : > { %v276_v36 = vperm.slane %v274_v27, 0  ;;  %v277_v37 = vperm.slane %v275_v28, 0 }
  0x27   : > { %v232_v10 = vmax.f32 %v230_v6, %v231_v8  ;;  %v239_v11 = vmax.f32 %v237_v7, %v238_v9 }
  0x28   : > { %vm278_vm2 = vcmp.eq.s32.totalorder %v273_v33, %v276_v36  ;;  %vm279_vm3 = vcmp.eq.s32.totalorder %v273_v33, %v277_v37 }
  0x29   : > { %v233_v12 = vrot.slane %v232_v10, 2  ;;  %v240_v13 = vrot.slane %v239_v11, 2 }
  0x2b   : > { %v234_v14 = vmax.f32 %v232_v10, %v233_v12  ;;  %v241_v15 = vmax.f32 %v239_v11, %v240_v13 }
  0x2d   : > { %v235_v16 = vrot.slane %v234_v14, 1  ;;  %v242_v17 = vrot.slane %v241_v15, 1 }
  0x2f   : > { %v236_v18 = vmax.f32 %v234_v14, %v235_v16  ;;  %v243_v19 = vmax.f32 %v241_v15, %v242_v17 }
  0x31   : > { %v246_v20 = vrot.slane %v243_v19, 4 }
  0x33   : > { %v247_v21 = vsel %vm229_vm1, %v236_v18, %v246_v20 }
  0x34   : > { %v249_v22 = vsub.f32 %v220_v3, %v247_v21 }
  0x36   : > { %v250_v23 = vmul.f32 1.442695, %v249_v22 }
  0x38   : > { %552 = vpow2.f32 %v250_v23 }
  0x3e   : > { %v553_v25 = vpop.eup %552 }
  0x3f   : > { %253 = vst [vmem:[#allocation1] ss:$2 sm:$0xff] %v553_v25 }
  0x46   : > { %v254_v29 = vld.sshfl [vmem:[#allocation1] sm:$0xff pattern:$0x75316420]  ;;  %v255_v30 = vld.sshfl [vmem:[#allocation1 + $0x8] sm:$0xff pattern:$0x75316420] }
  0x47   : > { %v258_v31 = vsel %vm229_vm1, %v254_v29, 0.0  ;;  %v265_v32 = vsel %vm229_vm1, %v255_v30, 0.0  ;;  %280 = vst [vmem:[#allocation1] ss:$2 sm:$0xff] %v553_v25  ;;  %v337_v25 = vld [vmem:[#allocation2] sm:$0x3] }
  0x48   : > { %v259_v34 = vrot.slane %v258_v31, 4  ;;  %v266_v35 = vrot.slane %v265_v32, 4 }
  0x4a   : > { %v260_v38 = vadd.f32 %v259_v34, %v258_v31  ;;  %v267_v39 = vadd.f32 %v266_v35, %v265_v32  ;;  %v350_v35 = vld [vmem:[#allocation3] sm:$0x3] }
  0x4c   : > { %v261_v40 = vrot.slane %v260_v38, 2  ;;  %v268_v41 = vrot.slane %v267_v39, 2 }
  0x4e   : > { %v262_v42 = vadd.f32 %v261_v40, %v260_v38  ;;  %v269_v43 = vadd.f32 %v268_v41, %v267_v39  ;;  %v281_v44 = vld.sshfl [vmem:[#allocation1] sm:$0xff pattern:$0x75316420]  ;;  %v282_v45 = vld.sshfl [vmem:[#allocation1 + $0x8] sm:$0xff pattern:$0x75316420] }
  0x4f   : > { %v285_v46 = vsel %vm278_vm2, %v281_v44, 0.0  ;;  %v286_v47 = vsel %vm279_vm3, %v282_v45, 0.0 }
  0x50   : > { %v263_v48 = vrot.slane %v262_v42, 1  ;;  %v270_v49 = vrot.slane %v269_v43, 1  ;;  %v287_v50 = vsel %vm229_vm1, %v285_v46, 0.0  ;;  %v294_v51 = vsel %vm229_vm1, %v286_v47, 0.0 }
  0x51   : > { %v288_v52 = vrot.slane %v287_v50, 4  ;;  %v295_v53 = vrot.slane %v294_v51, 4 }
  0x52   : > { %v264_v54 = vadd.f32 %v263_v48, %v262_v42  ;;  %v271_v55 = vadd.f32 %v270_v49, %v269_v43 }
  0x53   : > { %v289_v56 = vadd.f32 %v288_v52, %v287_v50  ;;  %v296_v57 = vadd.f32 %v295_v53, %v294_v51  ;;  %v647_v51 = vmov 512.01  }
  0x54   : > { %554 = vrcp.f32 %v264_v54  ;;  %vm306_vm4 = vweird.f32 %v264_v54  ;;  %v310_v2 = vand.u32 2147483647, %v264_v54  ;;  %v312_v3 = vand.u32 2147483648, %v264_v54 }
  0x55   : > { %v290_v58 = vrot.slane %v289_v56, 2  ;;  %556 = vrcp.f32 %v271_v55  ;;  %v297_v59 = vrot.slane %v296_v57, 2  ;;  %vm321_vm5 = vweird.f32 %v271_v55 }
  0x56   : > { %v327_v7 = vand.u32 2147483648, %v271_v55  ;;  %v325_v10 = vand.u32 2147483647, %v271_v55  ;;  %v313_v12 = vor.u32 1.1754944e-38, %v312_v3  ;;  %vm311_vm9 = vcmp.eq.f32.partialorder %v310_v2, 8.507059e+37 }
  0x57   : > { %v291_v60 = vadd.f32 %v290_v58, %v289_v56  ;;  %v298_v62 = vadd.f32 %v297_v59, %v296_v57 }
  0x58   : > { %v328_v16 = vor.u32 1.1754944e-38, %v327_v7  ;;  %vm326_vm11 = vcmp.eq.f32.partialorder %v325_v10, 8.507059e+37 }
  0x59   : > { %v292_v5 = vrot.slane %v291_v60, 1  ;;  %v299_v8 = vrot.slane %v298_v62, 1 }
  0x5a   : > { %v555_v61 = vpop.eup %554 }
  0x5b   : > { %v557_v63 = vpop.eup %556  ;;  %v302_v0 = vmul.f32 %v555_v61, %v264_v54  ;;  %vm307_vm6 = vweird.f32 %v555_v61  ;;  %v293_v14 = vadd.f32 %v292_v5, %v291_v60  ;;  %v300_v17 = vadd.f32 %v299_v8, %v298_v62 }
  0x5c   : > { %v317_v4 = vmul.f32 %v557_v63, %v271_v55  ;;  %vm322_vm7 = vweird.f32 %v557_v63  ;;  %vm308_vm8 = vmor %vm306_vm4, %vm307_vm6 }
  0x5d   : > { %v303_v6 = vsub.f32 1.0, %v302_v0  ;;  %vm323_vm10 = vmor %vm321_vm5, %vm322_vm7 }
  0x5e   : > { %v318_v9 = vsub.f32 1.0, %v317_v4 }
  0x5f   : > { %v304_v11 = vmul.f32 %v555_v61, %v303_v6 }
  0x60   : > { %v319_v13 = vmul.f32 %v557_v63, %v318_v9 }
  0x61   : > { %v305_v15 = vadd.f32 %v555_v61, %v304_v11 }
  0x62   : > { %v320_v18 = vadd.f32 %v557_v63, %v319_v13 }
  0x63   : > { %v309_v19 = vsel %vm308_vm8, %v555_v61, %v305_v15 }
  0x64   : > { %v314_v20 = vsel %vm311_vm9, %v313_v12, %v309_v19  ;;  %v324_v21 = vsel %vm323_vm10, %v557_v63, %v320_v18 }
  0x65   : > { %v315_v22 = vmul.f32 %v314_v20, %v293_v14  ;;  %v329_v23 = vsel %vm326_vm11, %v328_v16, %v324_v21 }
  0x66   : > { %v330_v24 = vmul.f32 %v329_v23, %v300_v17 }
  0x67   : > { %558 = vlog2.f32 %v315_v22 }
  0x68   : > { %560 = vlog2.f32 %v330_v24  ;;  %v340_v26 = vrot.slane %v330_v24, 7 }
  0x69   : > { %562 = vrcp.f32 %v647_v51 }
  0x6a   : > { %v342_v27 = vsel %vm341_vm12, %v315_v22, %v340_v26 }
  0x6b   : > { %v344_v28 = vadd.f32 %v342_v27, %v337_v25 }
  0x6d   : > { %v559_v29 = vpop.eup %558  ;;  %349 = vst.msk [vmem:[#allocation2] sm:$0x3] %vm728_vm0, %v344_v28 }
  0x6e   : > { %v561_v30 = vpop.eup %560  ;;  %v332_v31 = vmul.f32 0.6931472, %v559_v29 }
  0x6f   : > { %v334_v32 = vmul.f32 0.6931472, %v561_v30  ;;  %v563_v52 = vpop.eup %562 }
  0x70   : > { %v335_v33 = vsub.f32 0.0, %v332_v31  ;;  %v385_v53 = vmul.f32 512.01, %v563_v52  ;;  %vm389_vm13 = vweird.f32 %v563_v52 }
  0x71   : > { %v336_v34 = vsub.f32 0.0, %v334_v32 }
  0x72   : > { %v386_v54 = vsub.f32 1.0, %v385_v53 }
  0x73   : > { %v353_v36 = vrot.slane %v336_v34, 7 }
  0x74   : > { %v361_v37 = vld [vmem:[#allocation2] sm:$0x3]  ;;  %v387_v55 = vmul.f32 %v563_v52, %v386_v54 }
  0x75   : > { %v354_v38 = vsel %vm341_vm12, %v335_v33, %v353_v36  ;;  %v363_v39 = vperm.slane %v361_v37, 0  ;;  %v364_v40 = vperm.slane %v361_v37, 1 }
  0x76   : > { %v356_v41 = vadd.f32 %v354_v38, %v350_v35  ;;  %v388_v1 = vadd.f32 %v563_v52, %v387_v55 }
  0x77   : > { %v367_v42 = vsel %vm341_vm12, %v363_v39, 0.0  ;;  %v368_v43 = vsel %vm341_vm12, %v364_v40, 0.0 }
  0x78   : > { %357 = vst.msk [vmem:[#allocation3] sm:$0x3] %vm728_vm0, %v356_v41  ;;  %v369_v44 = vadd.f32 %v368_v43, %v367_v42  ;;  %v390_v58 = vsel %vm389_vm13, %v563_v52, %v388_v1 }
  0x7a   : > { %370 = vadd.xlane.f32.xlu0 %v369_v44 }
  0x7f   : > { %v372_v45 = vld [vmem:[#allocation3] sm:$0x3] }
  0x80   : > { %v374_v46 = vperm.slane %v372_v45, 0  ;;  %v375_v47 = vperm.slane %v372_v45, 1 }
  0x82   : > { %v378_v48 = vsel %vm341_vm12, %v374_v46, 0.0  ;;  %v379_v49 = vsel %vm341_vm12, %v375_v47, 0.0 }
  0x83   : > { %v380_v50 = vadd.f32 %v379_v49, %v378_v48 }
  0x85   : > { %381 = vadd.xlane.f32.xlu0 %v380_v50 }
  0xed   : > { %v371_v56 = vpop.xlane.xlu0 %370 }
  0xee   : > { %v383_v57 = vadd.f32 0.01, %v371_v56 }
  0xf0   : > { %v391_v59 = vmul.f32 %v390_v58, %v383_v57 }
  0xf2   : > { %v392_v61 = vsub.f32 1.0, %v391_v59 }
  0xf8   : > { %v382_v60 = vpop.xlane.xlu0 %381 }
  0xf9   : > { %v393_v62 = vmul.f32 0.00390625, %v382_v60 }
  0xfb   : > { %v394_v63 = vadd.f32 %v393_v62, %v392_v61 }
  0xfd   : > { %396 = vst.msk [vmem:[%s209_s20] sm:$0x1] %vm395_vm14, %v394_v63 }
  0xfe PF: > { %s15_s14 = sadd.s32 1, %s644_s14   ;;  %s791_s9 = smov %s628_s10 }
  0xff   : > { %p12_p0 = scmp.ge.s32.totalorder %s15_s14, 4   ;;  %s792_s10 = smov %s632_s11 }
 0x100   : > { %s793_s11 = smov %s712_s21  ;;  %s794_s12 = smov %s640_s13 }
 0x101   : > { %s795_s13 = smov %s797_s16  ;;  %14 = sbr.rel (!%p12_p0) target bundleno = 4 (0x4), region = 79 }
 0x106   :  { %414 = vsyncpa [#allocation5], 1 }
 0x107   :  { %416 = vsyncpa [#allocation5 + $0x1], 1 }

</bundles_post_ra>
